<compile_context>
chip_gen: v6e
topology: v6e:2x2x1
jax: 0.10.0
libtpu: 0.0.40
codegen_flags: <defaults>
</compile_context>

<pallas_src>
import math

import jax
import jax.numpy as jnp
from jax.experimental import pallas as pl
from jax.experimental.pallas import tpu as pltpu


def _round_up(x, m):
    return (x + m - 1) // m * m


def _pick_tile(dim, default, align):
    """Largest legal tile <= default; full extent when the dim is small."""
    if dim <= default:
        # Single block: full extent is always legal; otherwise align it.
        return dim if dim < align else _round_up(dim, align)
    return default


def _lora_linear_kernel(x_ref, w_ref, bias_ref, xa_ref, lb_ref, o_ref, acc_ref):
    """One (i, j) output tile, accumulated over the K grid axis.

    x_ref    : (tm, tk)   activation tile
    w_ref    : (tk, tn)   weight tile, (K, N) layout -> NN matmul (no XLU)
    bias_ref : (1, tn)    bias tile
    xa_ref   : (tm, r)    pre-scaled LoRA down-projection (x @ A.T) * scale
    lb_ref   : (r, tn)    lora_B in (rank, out) layout -> NN matmul
    o_ref    : (tm, tn)   output tile
    acc_ref  : (tm, tn)   f32 accumulator scratch, resident across the K axis
    """
    k = pl.program_id(2)

    @pl.when(k == 0)
    def _init():
        # Fold bias + the tiny LoRA up-projection into the accumulator init so
        # the last-K epilogue is just a cast + store.
        lora = jnp.dot(xa_ref[...], lb_ref[...],
                       preferred_element_type=jnp.float32)
        acc_ref[...] = bias_ref[...].astype(jnp.float32) + lora

    # Base matmul, NN layout: (tm, tk) @ (tk, tn), f32 accumulation.
    acc_ref[...] += jnp.dot(x_ref[...], w_ref[...],
                            preferred_element_type=jnp.float32)

    @pl.when(k == pl.num_programs(2) - 1)
    def _store():
        o_ref[...] = acc_ref[...].astype(o_ref.dtype)


def make_lora_linear(weight, bias, lora_A, lora_B, *, alpha=32,
                     tm=512, tn=512, tk=1024):
    """Builds a LoRALinear forward fn with all parameter prep done ONCE.

    weight: (out, in); bias: (out,) or None; lora_A: (rank, in); lora_B: (out, rank).
    Returns fn(x) with x of shape (..., in) -> (..., out).
    """
    N, K = weight.shape
    rank = lora_A.shape[0]
    scale = alpha / rank

    # ---- One-time parameter prep (hoisted out of the per-call path). ----
    tk_ = _pick_tile(K, tk, 128)
    Kp = _round_up(K, tk_)          # K zero-pad is REQUIRED for correctness.

    # Weight in (K, N) layout so the kernel does a plain NN contraction.
    w_kn = jnp.pad(jnp.transpose(weight), ((0, Kp - K), (0, 0)))
    # Bias (zeros if absent, matching nn.Linear(bias=None)).
    if bias is None:
        bias2d = jnp.zeros((1, N), dtype=weight.dtype)
    else:
        bias2d = bias.reshape(1, N)
    # lora_A transposed to (Kp, rank) with alpha/rank folded in (free at init).
    a_kr = (jnp.transpose(lora_A) * jnp.asarray(scale, lora_A.dtype))
    a_kr = jnp.pad(a_kr, ((0, Kp - K), (0, 0)))
    # lora_B transposed to (rank, N); rank stays unpadded (block dims may
    # equal the full array extent).
    lb_rn = jnp.transpose(lora_B)

    def apply(x):
        lead = x.shape[:-1]
        M = math.prod(lead) if lead else 1
        x2d = x.reshape(M, K)
        if Kp != K:
            x2d = jnp.pad(x2d, ((0, 0), (0, Kp - K)))

        # LoRA down-projection hoisted out of the hot K loop: (M, rank),
        # scale already folded into a_kr; keep the (tiny) operand in x.dtype.
        xa = jnp.dot(x2d, a_kr,
                     preferred_element_type=jnp.float32).astype(x.dtype)

        # Per-call tile selection (M is dynamic across calls; N/K are static).
        tm_ = _pick_tile(M, tm, 8)
        tn_ = _pick_tile(N, tn, 128)
        gm = pl.cdiv(M, tm_)
        gn = pl.cdiv(N, tn_)
        # v7x megacore: if M collapsed to one block, make sure the "parallel"
        # N axis has >= 2 blocks so both TensorCores get work.
        if gm == 1 and gn == 1 and N > 128:
            tn_ = _round_up(pl.cdiv(N, 2), 128)
            gn = pl.cdiv(N, tn_)
        grid = (gm, gn, Kp // tk_)

        out = pl.pallas_call(
            _lora_linear_kernel,
            out_shape=jax.ShapeDtypeStruct((M, N), x.dtype),
            grid_spec=pltpu.PrefetchScalarGridSpec(
                num_scalar_prefetch=0,
                grid=grid,
                in_specs=[
                    pl.BlockSpec((tm_, tk_), lambda i, j, k: (i, k)),    # x
                    pl.BlockSpec((tk_, tn_), lambda i, j, k: (k, j)),    # W (K,N)
                    pl.BlockSpec((1, tn_), lambda i, j, k: (0, j)),      # bias
                    pl.BlockSpec((tm_, rank), lambda i, j, k: (i, 0)),   # xa
                    pl.BlockSpec((rank, tn_), lambda i, j, k: (0, j)),   # lora_B.T
                ],
                out_specs=pl.BlockSpec((tm_, tn_), lambda i, j, k: (i, j)),
                scratch_shapes=[pltpu.VMEM((tm_, tn_), jnp.float32)],
            ),
            compiler_params=pltpu.CompilerParams(
                # M/N shard across TensorCores on v7x; K carries the accumulator.
                dimension_semantics=("parallel", "parallel", "arbitrary"),
                vmem_limit_bytes=48 * 1024 * 1024),
        )(x2d, w_kn, bias2d, xa, lb_rn)

        return out.reshape(*lead, N)

    return jax.jit(apply)


def _reference(x, weight, bias, lora_A, lora_B, alpha=32):
    rank = lora_A.shape[0]
    scale = alpha / rank
    base = jnp.einsum("...i,oi->...o", x, weight)
    if bias is not None:
        base = base + bias
    lora = jnp.einsum("...i,ri->...r", x, lora_A)
    lora = jnp.einsum("...r,or->...o", lora, lora_B) * scale
    return base + lora


if __name__ == "__main__":
    batch, seq = 2, 8
    in_features, out_features, rank, alpha = 32, 64, 8, 32

    key = jax.random.PRNGKey(0)
    kx, kw, kb, ka, kb2 = jax.random.split(key, 5)

    x = jax.random.normal(kx, (batch, seq, in_features), dtype=jnp.float32)

    # nn.Linear default init: uniform(-1/sqrt(in), 1/sqrt(in)).
    bound = 1.0 / math.sqrt(in_features)
    weight = jax.random.uniform(kw, (out_features, in_features),
                                minval=-bound, maxval=bound, dtype=jnp.float32)
    bias = jax.random.uniform(kb, (out_features,),
                              minval=-bound, maxval=bound, dtype=jnp.float32)

    # Module init: lora_A ~ N(0, 1/sqrt(in)), lora_B = zeros.
    lora_A = jax.random.normal(ka, (rank, in_features),
                               dtype=jnp.float32) / math.sqrt(in_features)
    lora_B = jnp.zeros((out_features, rank), dtype=jnp.float32)

    fwd = make_lora_linear(weight, bias, lora_A, lora_B, alpha=alpha)
    out = fwd(x)
    jax.block_until_ready(out)
    ref = _reference(x, weight, bias, lora_A, lora_B, alpha=alpha)
    assert out.shape == ref.shape
    assert jnp.allclose(out, ref, atol=1e-5, rtol=1e-5)

    # Non-zero lora_B to exercise the LoRA up-projection path.
    lora_B_nz = jax.random.normal(kb2, (out_features, rank),
                                  dtype=jnp.float32) * 0.02
    fwd_nz = make_lora_linear(weight, bias, lora_A, lora_B_nz, alpha=alpha)
    out2 = fwd_nz(x)
    jax.block_until_ready(out2)
    ref2 = _reference(x, weight, bias, lora_A, lora_B_nz, alpha=alpha)
    assert jnp.allclose(out2, ref2, atol=1e-5, rtol=1e-5)

    # bias=None path (nn.Linear allows a missing bias).
    fwd_nb = make_lora_linear(weight, None, lora_A, lora_B_nz, alpha=alpha)
    out3 = fwd_nb(x)
    jax.block_until_ready(out3)
    ref3 = _reference(x, weight, None, lora_A, lora_B_nz, alpha=alpha)
    assert jnp.allclose(out3, ref3, atol=1e-5, rtol=1e-5)

    print("KERNEL_OK")
</pallas_src>

<mosaic_0001>
module attributes {stable_mosaic.version = 11 : i64} {
  func.func @_lora_linear_kernel(%arg0: i32, %arg1: i32, %arg2: i32, %arg3: memref<16x32xf32, #tpu.memory_space<vmem>>, %arg4: memref<32x64xf32, #tpu.memory_space<vmem>>, %arg5: memref<1x64xf32, #tpu.memory_space<vmem>>, %arg6: memref<16x8xf32, #tpu.memory_space<vmem>>, %arg7: memref<8x64xf32, #tpu.memory_space<vmem>>, %arg8: memref<16x64xf32, #tpu.memory_space<vmem>>, %arg9: memref<16x64xf32, #tpu.memory_space<vmem>>) attributes {dimension_semantics = [#tpu.dimension_semantics<parallel>, #tpu.dimension_semantics<parallel>, #tpu.dimension_semantics<arbitrary>], iteration_bounds = array<i64: 1, 1, 1>, scalar_prefetch = 0 : i64, scratch_operands = 1 : i64, tpu.core_type = #tpu.core_type<tc>, window_params = [{transform_indices = @transform_0, window_bounds = array<i64: 16, 32>}, {transform_indices = @transform_1, window_bounds = array<i64: 32, 64>}, {transform_indices = @transform_2, window_bounds = array<i64: 1, 64>}, {transform_indices = @transform_3, window_bounds = array<i64: 16, 8>}, {transform_indices = @transform_4, window_bounds = array<i64: 8, 64>}, {transform_indices = @transform_5, window_bounds = array<i64: 16, 64>}]} {
    %c0_i32 = arith.constant 0 : i32
    %0 = arith.cmpi eq, %arg2, %c0_i32 : i32
    %1 = arith.extui %0 : i1 to i32
    %c0_i32_0 = arith.constant 0 : i32
    %2 = arith.cmpi ne, %1, %c0_i32_0 : i32
    scf.if %2 {
      %c0_10 = arith.constant 0 : index
      %c0_11 = arith.constant 0 : index
      %12 = vector.load %arg6[%c0_10, %c0_11] : memref<16x8xf32, #tpu.memory_space<vmem>>, vector<16x8xf32>
      %c0_12 = arith.constant 0 : index
      %c0_13 = arith.constant 0 : index
      %13 = vector.load %arg7[%c0_12, %c0_13] : memref<8x64xf32, #tpu.memory_space<vmem>>, vector<8x64xf32>
      %cst_14 = arith.constant dense<0.000000e+00> : vector<16x64xf32>
      %14 = tpu.matmul %12, %13, %cst_14 {dimension_numbers = #tpu.dot_dimension_numbers<[1], [0], [0], [1], [0, 0, 1, 1], [], []>} : vector<16x8xf32>, vector<8x64xf32>, vector<16x64xf32> -> vector<16x64xf32>
      %c0_15 = arith.constant 0 : index
      %c0_16 = arith.constant 0 : index
      %15 = vector.load %arg5[%c0_15, %c0_16] : memref<1x64xf32, #tpu.memory_space<vmem>>, vector<1x64xf32>
      %16 = vector.broadcast %15 : vector<1x64xf32> to vector<16x64xf32>
      %17 = arith.addf %16, %14 : vector<16x64xf32>
      %c0_17 = arith.constant 0 : index
      %c0_18 = arith.constant 0 : index
      %18 = vector.load %arg9[%c0_17, %c0_18] : memref<16x64xf32, #tpu.memory_space<vmem>>, vector<16x64xf32>
      tpu.vector_store %arg9[%c0_17, %c0_18], %17 {strides = array<i32>} : memref<16x64xf32, #tpu.memory_space<vmem>>, vector<16x64xf32>,
    } else {
    }
    %c0 = arith.constant 0 : index
    %c0_1 = arith.constant 0 : index
    %3 = vector.load %arg9[%c0, %c0_1] : memref<16x64xf32, #tpu.memory_space<vmem>>, vector<16x64xf32>
    %c0_2 = arith.constant 0 : index
    %c0_3 = arith.constant 0 : index
    %4 = vector.load %arg3[%c0_2, %c0_3] : memref<16x32xf32, #tpu.memory_space<vmem>>, vector<16x32xf32>
    %c0_4 = arith.constant 0 : index
    %c0_5 = arith.constant 0 : index
    %5 = vector.load %arg4[%c0_4, %c0_5] : memref<32x64xf32, #tpu.memory_space<vmem>>, vector<32x64xf32>
    %cst = arith.constant dense<0.000000e+00> : vector<16x64xf32>
    %6 = tpu.matmul %4, %5, %cst {dimension_numbers = #tpu.dot_dimension_numbers<[1], [0], [0], [1], [0, 0, 1, 1], [], []>} : vector<16x32xf32>, vector<32x64xf32>, vector<16x64xf32> -> vector<16x64xf32>
    %7 = arith.addf %3, %6 : vector<16x64xf32>
    %c0_6 = arith.constant 0 : index
    %c0_7 = arith.constant 0 : index
    %8 = vector.load %arg9[%c0_6, %c0_7] : memref<16x64xf32, #tpu.memory_space<vmem>>, vector<16x64xf32>
    tpu.vector_store %arg9[%c0_6, %c0_7], %7 {strides = array<i32>} : memref<16x64xf32, #tpu.memory_space<vmem>>, vector<16x64xf32>,
    %c0_i32_8 = arith.constant 0 : i32
    %9 = arith.cmpi eq, %arg2, %c0_i32_8 : i32
    %10 = arith.extui %9 : i1 to i32
    %c0_i32_9 = arith.constant 0 : i32
    %11 = arith.cmpi ne, %10, %c0_i32_9 : i32
    scf.if %11 {
      %c0_10 = arith.constant 0 : index
      %c0_11 = arith.constant 0 : index
      %12 = vector.load %arg9[%c0_10, %c0_11] : memref<16x64xf32, #tpu.memory_space<vmem>>, vector<16x64xf32>
      %c0_12 = arith.constant 0 : index
      %c0_13 = arith.constant 0 : index
      %13 = vector.load %arg8[%c0_12, %c0_13] : memref<16x64xf32, #tpu.memory_space<vmem>>, vector<16x64xf32>
      tpu.vector_store %arg8[%c0_12, %c0_13], %12 {strides = array<i32>} : memref<16x64xf32, #tpu.memory_space<vmem>>, vector<16x64xf32>,
    } else {
    }
    return
  }
  func.func @transform_0(%arg0: i32, %arg1: i32, %arg2: i32) -> (i32, i32) {
    %c0_i32 = arith.constant 0 : i32
    return %arg0, %arg2 : i32, i32
  }
  func.func @transform_1(%arg0: i32, %arg1: i32, %arg2: i32) -> (i32, i32) {
    %c0_i32 = arith.constant 0 : i32
    return %arg2, %arg1 : i32, i32
  }
  func.func @transform_2(%arg0: i32, %arg1: i32, %arg2: i32) -> (i32, i32) {
    %c0_i32 = arith.constant 0 : i32
    %c0_i32_0 = arith.constant 0 : i32
    return %c0_i32, %arg1 : i32, i32
  }
  func.func @transform_3(%arg0: i32, %arg1: i32, %arg2: i32) -> (i32, i32) {
    %c0_i32 = arith.constant 0 : i32
    %c0_i32_0 = arith.constant 0 : i32
    return %arg0, %c0_i32 : i32, i32
  }
  func.func @transform_4(%arg0: i32, %arg1: i32, %arg2: i32) -> (i32, i32) {
    %c0_i32 = arith.constant 0 : i32
    %c0_i32_0 = arith.constant 0 : i32
    return %c0_i32, %arg1 : i32, i32
  }
  func.func @transform_5(%arg0: i32, %arg1: i32, %arg2: i32) -> (i32, i32) {
    %c0_i32 = arith.constant 0 : i32
    return %arg0, %arg1 : i32, i32
  }
}

</mosaic_0001>

<bundles_post_ra>
// kernel: apply.1
= control target key start
LH: loop header
LB: loop body
LE: loop exit
PB: predicated region body
PF: predicated region fallthrough
CT: control target
= control target key end

     0   :  { %vm28_vm0 = vcmask 64512   ;;  %vm130_vm1 = vcmask 261120   ;;  %s369_s0 = inlined_call_operand.vmem [shape: f32[16,32], index: 0, kind: input, shape index: {}]   ;;  %s370_s1 = inlined_call_operand.vmem [shape: f32[32,64], index: 1, kind: input, shape index: {}]   ;;  %s371_s2 = inlined_call_operand.vmem [shape: f32[1,64], index: 2, kind: input, shape index: {}]   ;;  %s372_s3 = inlined_call_operand.vmem [shape: f32[16,8], index: 3, kind: input, shape index: {}]   ;;  %s373_s4 = inlined_call_operand.vmem [shape: f32[8,64], index: 4, kind: input, shape index: {}]   ;;  %s374_s5 = inlined_call_operand.hbm [shape: f32[16,64], index: 5, kind: output, shape index: {}]  }
   0x1   :  { %v27_v0 = vld [vmem:[%s373_s4] sm:$0xff]  ;;  %v26_v2 = vld [vmem:[%s372_s3 + $0x8] sm:$0xff]  ;;  %v129_v3 = vld [vmem:[%s370_s1 + $0x18] sm:$0xff] }
   0x2   :  { %v25_v1 = vld [vmem:[%s372_s3] sm:$0xff]  ;;  %254 = vmatprep.subr.mxu0 %v27_v0  ;;  %v128_v4 = vld [vmem:[%s370_s1 + $0x10] sm:$0xff]  ;;  %259 = vmatprep.subr.mxu1 %v129_v3  ;;  %v127_v6 = vld [vmem:[%s370_s1 + $0x8] sm:$0xff] }
   0x3   :  { %256 = vmatprep.mubr.msk.f32.mxu0 %vm28_vm0, %v25_v1  ;;  %255 = vmatpush3.msra.mxu0 %v27_v0  ;;  %v124_v5 = vld [vmem:[%s369_s0] sm:$0xff] }
   0x4   :  { %257 = vmatmul.mubr.msk.f32.vlgmr.msra.gmra.mxu0 %vm28_vm0, %v26_v2  ;;  %260 = vmatpush3.msra.mxu1 %v129_v3 }
   0x5   :  { %10 = vsyncpa [#allocation4], 0  ;;  %261 = vmatprep.subr.mxu1 %v128_v4  ;;  %267 = vmatprep.mubr.msk.f32.mxu1 %vm130_vm1, %v124_v5  ;;  %v126_v7 = vld [vmem:[%s370_s1] sm:$0xff]  ;;  %v125_v8 = vld [vmem:[%s369_s0 + $0x8] sm:$0xff]  ;;  %vm119_vm2 = vcmask 523264   ;;  %s295_s0 = smov [#allocation3]  }
   0x6   :  { %262 = vmatpush3.msra.mxu1 %v128_v4  ;;  %v242_v9 = vld [vmem:[%s371_s2] ss:$0 sm:$0xff]  ;;  %s229_s1 = sshll.u32 %s295_s0, 4  ;;  %s230_s1 = int_to_ptr.vmem [resolvable:$true] %s229_s1 }
   0x7   :  { %263 = vmatprep.subr.mxu1 %v127_v6  ;;  %s273_s2 = scalar_lea.vmem %s230_s1, 256  ;;  %p278_p1 = scmp.lt.s32.totalorder %s230_s1, %s230_s1 }
   0x8   :  { %264 = vmatpush3.msra.mxu1 %v127_v6  ;;  %p274_p0 = scmp.ne.s32.totalorder %s230_s1, %s273_s2  ;;  %p279_p2 = scmp.lt.s32.totalorder %s273_s2, %s273_s2 }
   0x9   :  { %265 = vmatprep.subr.mxu1 %v126_v7 }
   0xa   :  { %266 = vmatpush3.msra.mxu1 %v126_v7  ;;  %p280_p3 = por %p279_p2, %p278_p1 }
   0xb   :  { %268 = vmatmul.mubr.msk.f32.vlgmr.msra.gmra.mxu1 %vm130_vm1, %v125_v8 }
   0xc   :  { %p281_p4 = pnand %p280_p3, %p274_p0 }
  0xc4   :  { %v258_v10 = vpop.f32.mrf.mxu0 }
  0xc5   :  { %v118_v11 = vadd.f32 %v258_v10, %v242_v9 }
  0xc6   :  { %v101_v12 = vpop.f32.mrf.mxu0 }
  0xc7   :  { %121 = vst.msk [vmem:[#allocation2 + $0x8] sm:$0xff] %vm119_vm2, %v118_v11  ;;  %v117_v13 = vadd.f32 %v242_v9, %v101_v12 }
  0xc9   :  { %120 = vst.msk [vmem:[#allocation2] sm:$0xff] %vm119_vm2, %v117_v13 }
  0xcb   :  { %v269_v14 = vpop.f32.mrf.mxu1 }
  0xcd   :  { %v203_v18 = vpop.f32.mrf.mxu1 }
  0xce   :  { %v123_v15 = vld [vmem:[#allocation2 + $0x8] sm:$0xff] }
  0xcf   :  { %v213_v16 = vadd.f32 %v269_v14, %v123_v15 }
  0xd0   :  { %v122_v17 = vld [vmem:[#allocation2] sm:$0xff] }
  0xd1   :  { %216 = vst.msk [vmem:[#allocation2 + $0x8] sm:$0xff] %vm119_vm2, %v213_v16  ;;  %v212_v19 = vadd.f32 %v203_v18, %v122_v17 }
  0xd3   :  { %215 = vst.msk [vmem:[#allocation2] sm:$0xff] %vm119_vm2, %v212_v19 }
  0xd8   :  { %v221_v20 = vld [vmem:[#allocation2 + $0x8] sm:$0xff] }
  0xd9   :  { %223 = vst.msk [vmem:[#allocation3 + $0x8] sm:$0xff] %vm119_vm2, %v221_v20 }
  0xda   :  { %v220_v21 = vld [vmem:[#allocation2] sm:$0xff] }
  0xdb   :  { %222 = vst.msk [vmem:[#allocation3] sm:$0xff] %vm119_vm2, %v220_v21 }
  0xdc   :  { %284 = shalt.err (!%p281_p4)
}
  0xdd   :  { %s296_s11 = smov 128   ;;  %s297_s12 = smov 8  }
  0xde   :  { %235 = dma.vmem_to_hbm [thread:$0]  %s230_s1, 256, %s374_s5, [#allocation4], %s296_s11, %s296_s11, %s297_s12  }
  0xdf   :  { %293 = dma.done.wait [#allocation4], 256  }
  0xe0   :  { %294 = vsyncadd [#allocation4], 4294967040 }
  0xe1   :  { %239 = vsyncpa [#allocation4], 1 }

</bundles_post_ra>
